<compile_context>
chip_gen: v6e
topology: v6e:2x2x1
jax: 0.10.0
libtpu: 0.0.40
codegen_flags: <defaults>
</compile_context>

<pallas_src>
import functools

import jax
import jax.numpy as jnp
from jax.experimental import pallas as pl
from jax.experimental.pallas import tpu as pltpu


def _round_up(x, m):
    return ((x + m - 1) // m) * m


def _vmem_budget_bytes():
    """Generation-aware budget for the pipelined per-step working set."""
    try:
        cap = int(pltpu.get_tpu_info().vmem_capacity_bytes)
    except Exception:
        cap = 64 * 1024 * 1024  # conservative (v7x-sized) fallback
    # ~40% of physical VMEM: v7x (64 MiB) -> ~25 MiB, v5e/v6e (128 MiB) -> 48 MiB cap.
    return int(min(48 * 1024 * 1024, max(16 * 1024 * 1024, cap * 2 // 5)))


def _working_set_bytes_per_row(c, itemsize):
    # double-buffered native-dtype logits block + ~4 full-width f32 temporaries
    return c * (2 * itemsize + 16)


def _choose_tile_n(n, c, itemsize, vmem_budget):
    """Largest row tile whose real working set fits the VMEM budget."""
    per_row = max(1, _working_set_bytes_per_row(c, itemsize))
    max_rows = max(8, vmem_budget // per_row)
    tile = min(4096, max_rows, _round_up(n, 8))
    tile = max(8, (tile // 8) * 8)
    # Ensure >= 2 grid blocks so both v7x TensorCores get work along the
    # 'parallel' axis (one extra ~0.35us grid step is negligible on 1-TC chips).
    if n >= 16 and pl.cdiv(n, tile) < 2:
        tile = max(8, _round_up(pl.cdiv(n, 2), 8))
    return tile


def _make_focal_kernel(gamma, reduction, has_alpha, alpha_scalar, n_rows, tile_n):
    """Builds a kernel closure with static config baked in."""
    g = float(gamma)

    def kernel(*refs):
        if has_alpha:
            logits_ref, labels_ref, alpha_ref, out_ref = refs
        else:
            logits_ref, labels_ref, out_ref = refs

        x = logits_ref[...]                                  # [tn, C] native dtype
        labels = labels_ref[...]                             # [tn, 1] int32
        tn, c = x.shape

        # (1, C) class-id iota; broadcast compare against [tn, 1] labels -> bool one-hot.
        cls_ids = jax.lax.broadcasted_iota(jnp.int32, (1, c), 1)
        onehot = cls_ids == labels                            # [tn, C] bool (no f32 temp)

        # Row max + label-logit gather in native dtype (exact: select / sum with zeros).
        m = jnp.max(x, axis=-1, keepdims=True)                # [tn, 1]
        x_label = jnp.sum(jnp.where(onehot, x, jnp.zeros_like(x)),
                          axis=-1, keepdims=True)             # [tn, 1]

        mf = m.astype(jnp.float32)
        ex = jnp.exp(x.astype(jnp.float32) - mf)              # [tn, C] f32 (one exp pass)
        sum_exp = jnp.sum(ex, axis=-1, keepdims=True)         # [tn, 1]

        ce = jnp.log(sum_exp) - (x_label.astype(jnp.float32) - mf)   # per-sample CE
        pt = jnp.exp(-ce)                                     # [tn, 1]; EUP slot, cheap

        one_minus_pt = jnp.maximum(1.0 - pt, 0.0)
        if g == 2.0:                                          # default: no pow/EUP traffic
            modulating = one_minus_pt * one_minus_pt
        elif g.is_integer() and 0.0 <= g <= 16.0:
            modulating = jax.lax.integer_pow(one_minus_pt, int(g))
        else:                                                 # guard pow corner cases
            modulating = jnp.where(one_minus_pt > 0.0, one_minus_pt ** g, 0.0)

        if has_alpha:
            alpha_row = alpha_ref[...]                        # [1, C] f32, resident block
            alpha_t = jnp.sum(jnp.where(onehot, alpha_row, 0.0),
                              axis=-1, keepdims=True)
            focal = alpha_t * modulating * ce
        elif alpha_scalar != 1.0:
            focal = alpha_scalar * (modulating * ce)
        else:
            focal = modulating * ce

        # Mask rows beyond the true batch (ragged last tile reads undefined data).
        row0 = pl.program_id(0) * tile_n
        row_ids = row0 + jax.lax.broadcasted_iota(jnp.int32, (tn, 1), 0)
        focal = jnp.where(row_ids < n_rows, focal, 0.0)

        if reduction in ("mean", "sum"):
            out_ref[0, 0] = jnp.sum(focal)                    # per-tile partial -> SMEM
        else:  # 'none': lane-dense store; [tn,1]->[1,1,tn] relayout rides the XLU
            out_ref[...] = focal.reshape(1, 1, tn)

    return kernel


@functools.partial(jax.jit, static_argnames=("gamma", "reduction", "has_alpha_vec",
                                              "alpha_scalar"))
def _focal_loss_call(outputs, labels, alpha_vec, *, gamma, reduction,
                     has_alpha_vec, alpha_scalar):
    n, c = outputs.shape
    itemsize = jnp.dtype(outputs.dtype).itemsize

    budget = _vmem_budget_bytes()
    tile_n = _choose_tile_n(n, c, itemsize, budget)
    num_tiles = pl.cdiv(n, tile_n)
    grid = (num_tiles,)

    labels2d = labels.reshape(n, 1).astype(jnp.int32)
    kernel = _make_focal_kernel(gamma, reduction, has_alpha_vec, alpha_scalar,
                                n, tile_n)

    in_specs = [
        pl.BlockSpec((tile_n, c), lambda i: (i, 0)),           # logits row tile
        pl.BlockSpec((tile_n, 1), lambda i: (i, 0)),           # labels column tile
    ]
    args = (outputs, labels2d)
    if has_alpha_vec:
        in_specs.append(pl.BlockSpec((1, c), lambda i: (0, 0)))  # resident across steps
        args = args + (alpha_vec.reshape(1, c).astype(jnp.float32),)

    if reduction in ("mean", "sum"):
        out_shape = jax.ShapeDtypeStruct((num_tiles, 1), jnp.float32)
        out_specs = pl.BlockSpec((1, 1), lambda i: (i, 0),
                                 memory_space=pltpu.MemorySpace.SMEM)
        out_bytes = num_tiles * 4
    else:  # 'none': lane-dense padded slab, reshaped/sliced in the wrapper
        out_shape = jax.ShapeDtypeStruct((num_tiles, 1, tile_n), jnp.float32)
        out_specs = pl.BlockSpec((1, 1, tile_n), lambda i: (i, 0, 0))
        out_bytes = num_tiles * tile_n * 4

    # vmem limit from the actual working set + headroom (generation-aware budget cap)
    work_bytes = tile_n * _working_set_bytes_per_row(c, itemsize) + (1 << 20)
    vmem_limit = int(min(max(work_bytes * 3 // 2, 16 * 1024 * 1024), 2 * budget))

    cost = pl.CostEstimate(
        flops=int(6 * n * c),
        transcendentals=int(n * c + 3 * n),
        bytes_accessed=int(n * c * itemsize + n * 4
                           + (c * 4 if has_alpha_vec else 0) + out_bytes),
    )

    out = pl.pallas_call(
        kernel,
        out_shape=out_shape,
        grid=grid,
        in_specs=in_specs,
        out_specs=out_specs,
        compiler_params=pltpu.CompilerParams(
            dimension_semantics=("parallel",),
            vmem_limit_bytes=vmem_limit,
        ),
        cost_estimate=cost,
    )(*args)

    if reduction == "mean":
        return jnp.sum(out) * (1.0 / float(n))
    if reduction == "sum":
        return jnp.sum(out)
    return out.reshape(-1)[:n]


def focal_loss(outputs, labels, alpha=None, gamma=2.0, reduction="mean"):
    """JAX/Pallas equivalent of FocalLoss.forward(outputs, labels).

    outputs: [N, C] float logits (kept in native dtype, e.g. bf16), labels: [N] ints.
    alpha: None | python/numpy/jnp scalar | [C] array of per-class weights.
    """
    outputs = jnp.asarray(outputs)                    # no forced f32 upcast (HBM bytes)
    labels = jnp.asarray(labels, jnp.int32)

    is_scalar_alpha = isinstance(alpha, (float, int)) or (
        alpha is not None and getattr(alpha, "ndim", None) == 0)
    has_alpha_vec = alpha is not None and not is_scalar_alpha
    alpha_scalar = float(alpha) if (alpha is not None and is_scalar_alpha) else 1.0
    alpha_vec = jnp.asarray(alpha, jnp.float32) if has_alpha_vec else None

    return _focal_loss_call(outputs, labels, alpha_vec,
                            gamma=float(gamma), reduction=reduction,
                            has_alpha_vec=has_alpha_vec, alpha_scalar=alpha_scalar)


def _focal_loss_ref(outputs, labels, alpha=None, gamma=2.0, reduction="mean"):
    """Pure-JAX reference (mirrors the PyTorch module)."""
    logp = jax.nn.log_softmax(jnp.asarray(outputs, jnp.float32), axis=-1)
    ce = -jnp.take_along_axis(logp, labels[:, None], axis=-1)[:, 0]
    pt = jnp.exp(-ce)
    if alpha is not None:
        if isinstance(alpha, (float, int)) or getattr(alpha, "ndim", None) == 0:
            alpha_t = jnp.float32(alpha)
        else:
            alpha_t = jnp.asarray(alpha, jnp.float32)[labels]
        fl = alpha_t * (1.0 - pt) ** gamma * ce
    else:
        fl = (1.0 - pt) ** gamma * ce
    if reduction == "mean":
        return fl.mean()
    if reduction == "sum":
        return fl.sum()
    return fl


if __name__ == "__main__":
    key = jax.random.PRNGKey(0)
    k1, k2, k3, k4 = jax.random.split(key, 4)

    # --- small shapes, all module configs ---
    N, C = 8, 16
    outputs = jax.random.normal(k1, (N, C), dtype=jnp.float32) * 2.0
    labels = jax.random.randint(k2, (N,), 0, C, dtype=jnp.int32)
    alpha_vec = 0.25 + 0.05 * jnp.arange(C, dtype=jnp.float32)

    loss = focal_loss(outputs, labels)                         # alpha=None, gamma=2, mean
    jax.block_until_ready(loss)
    ref = _focal_loss_ref(outputs, labels)
    assert jnp.allclose(loss, ref, rtol=1e-5, atol=1e-5), (loss, ref)

    loss_a = focal_loss(outputs, labels, alpha=alpha_vec, gamma=2.0, reduction="sum")
    jax.block_until_ready(loss_a)
    ref_a = _focal_loss_ref(outputs, labels, alpha=alpha_vec, gamma=2.0, reduction="sum")
    assert jnp.allclose(loss_a, ref_a, rtol=1e-5, atol=1e-5), (loss_a, ref_a)

    loss_n = focal_loss(outputs, labels, alpha=0.5, gamma=1.5, reduction="none")
    jax.block_until_ready(loss_n)
    ref_n = _focal_loss_ref(outputs, labels, alpha=0.5, gamma=1.5, reduction="none")
    assert jnp.allclose(loss_n, ref_n, rtol=1e-5, atol=1e-5)

    # scalar alpha passed as a 0-d jnp value (robustness fix)
    loss_s = focal_loss(outputs, labels, alpha=jnp.float32(0.5), gamma=2.0,
                        reduction="mean")
    jax.block_until_ready(loss_s)
    ref_s = _focal_loss_ref(outputs, labels, alpha=0.5, gamma=2.0, reduction="mean")
    assert jnp.allclose(loss_s, ref_s, rtol=1e-5, atol=1e-5), (loss_s, ref_s)

    # --- gridded path: multiple row tiles, ragged tail masking, bf16 logits ---
    N2, C2 = 1100, 256
    out2 = (jax.random.normal(k3, (N2, C2), dtype=jnp.float32) * 3.0).astype(jnp.bfloat16)
    lab2 = jax.random.randint(k4, (N2,), 0, C2, dtype=jnp.int32)
    alpha2 = 0.1 + 0.9 * jax.random.uniform(k1, (C2,), dtype=jnp.float32)

    for red in ("mean", "sum", "none"):
        got = focal_loss(out2, lab2, alpha=alpha2, gamma=2.0, reduction=red)
        jax.block_until_ready(got)
        want = _focal_loss_ref(out2.astype(jnp.float32), lab2, alpha=alpha2,
                               gamma=2.0, reduction=red)
        assert jnp.allclose(got, want, rtol=1e-4, atol=1e-4), (red, got, want)

    print("KERNEL_OK")
</pallas_src>

<mosaic_0001>
module attributes {stable_mosaic.version = 11 : i64} {
  func.func @kernel(%arg0: i32, %arg1: memref<8x16xf32, #tpu.memory_space<vmem>>, %arg2: memref<8x1xi32, #tpu.memory_space<vmem>>, %arg3: memref<1x1xf32, #tpu.memory_space<smem>>) attributes {dimension_semantics = [#tpu.dimension_semantics<parallel>], iteration_bounds = array<i64: 1>, scalar_prefetch = 0 : i64, scratch_operands = 0 : i64, tpu.core_type = #tpu.core_type<tc>, window_params = [{transform_indices = @transform_0, window_bounds = array<i64: 8, 16>}, {transform_indices = @transform_1, window_bounds = array<i64: 8, 1>}, {transform_indices = @transform_2, window_bounds = array<i64: 1, 1>}]} {
    %c0 = arith.constant 0 : index
    %c0_0 = arith.constant 0 : index
    %0 = vector.load %arg1[%c0, %c0_0] : memref<8x16xf32, #tpu.memory_space<vmem>>, vector<8x16xf32>
    %c0_1 = arith.constant 0 : index
    %c0_2 = arith.constant 0 : index
    %1 = vector.load %arg2[%c0_1, %c0_2] : memref<8x1xi32, #tpu.memory_space<vmem>>, vector<8x1xi32>
    %2 = tpu.iota {dimensions = array<i32: 1>} : vector<1x16xi32>
    %3 = vector.broadcast %2 : vector<1x16xi32> to vector<8x16xi32>
    %4 = vector.broadcast %1 : vector<8x1xi32> to vector<8x16xi32>
    %5 = arith.cmpi eq, %3, %4 : vector<8x16xi32>
    %cst = arith.constant dense<0xFF800000> : vector<8xf32>
    %6 = vector.multi_reduction <maximumf>, %0, %cst [1] : vector<8x16xf32> to vector<8xf32>
    %7 = vector.shape_cast %6 : vector<8xf32> to vector<8x1xf32>
    %cst_3 = arith.constant 0.000000e+00 : f32
    %8 = vector.broadcast %cst_3 : f32 to vector<8x16xf32>
    %9 = arith.select %5, %0, %8 : vector<8x16xi1>, vector<8x16xf32>
    %cst_4 = arith.constant dense<0.000000e+00> : vector<8xf32>
    %10 = vector.multi_reduction <add>, %9, %cst_4 [1] : vector<8x16xf32> to vector<8xf32>
    %11 = vector.shape_cast %10 : vector<8xf32> to vector<8x1xf32>
    %12 = vector.broadcast %7 : vector<8x1xf32> to vector<8x16xf32>
    %13 = arith.subf %0, %12 : vector<8x16xf32>
    %14 = math.exp %13 : vector<8x16xf32>
    %cst_5 = arith.constant dense<0.000000e+00> : vector<8xf32>
    %15 = vector.multi_reduction <add>, %14, %cst_5 [1] : vector<8x16xf32> to vector<8xf32>
    %16 = vector.shape_cast %15 : vector<8xf32> to vector<8x1xf32>
    %17 = math.log %16 : vector<8x1xf32>
    %18 = arith.subf %11, %7 : vector<8x1xf32>
    %19 = arith.subf %17, %18 : vector<8x1xf32>
    %cst_6 = arith.constant 0.000000e+00 : f32
    %20 = vector.broadcast %cst_6 : f32 to vector<8x1xf32>
    %21 = arith.subf %20, %19 : vector<8x1xf32>
    %22 = math.exp %21 : vector<8x1xf32>
    %cst_7 = arith.constant 1.000000e+00 : f32
    %23 = vector.broadcast %cst_7 : f32 to vector<8x1xf32>
    %24 = arith.subf %23, %22 : vector<8x1xf32>
    %cst_8 = arith.constant 0.000000e+00 : f32
    %25 = vector.broadcast %cst_8 : f32 to vector<8x1xf32>
    %26 = arith.maximumf %24, %25 : vector<8x1xf32>
    %27 = arith.mulf %26, %26 : vector<8x1xf32>
    %28 = arith.mulf %27, %19 : vector<8x1xf32>
    %c8_i32 = arith.constant 8 : i32
    %29 = arith.muli %arg0, %c8_i32 : i32
    %30 = tpu.iota {dimensions = array<i32: 0>} : vector<8x1xi32>
    %31 = vector.broadcast %29 : i32 to vector<8x1xi32>
    %32 = arith.addi %31, %30 : vector<8x1xi32>
    %c8_i32_9 = arith.constant 8 : i32
    %33 = vector.broadcast %c8_i32_9 : i32 to vector<8x1xi32>
    %34 = arith.cmpi slt, %32, %33 : vector<8x1xi32>
    %cst_10 = arith.constant 0.000000e+00 : f32
    %35 = vector.broadcast %cst_10 : f32 to vector<8x1xf32>
    %36 = arith.select %34, %28, %35 : vector<8x1xi1>, vector<8x1xf32>
    %37 = vector.shape_cast %36 : vector<8x1xf32> to vector<1x8x1xf32>
    %cst_11 = arith.constant dense<0.000000e+00> : vector<1xf32>
    %38 = vector.multi_reduction <add>, %37, %cst_11 [1, 2] : vector<1x8x1xf32> to vector<1xf32>
    %39 = vector.shape_cast %38 : vector<1xf32> to vector<1x1x1xf32>
    %40 = vector.extract %39[0, 0, 0] : f32 from vector<1x1x1xf32>
    %c0_12 = arith.constant 0 : index
    %c0_13 = arith.constant 0 : index
    %41 = memref.load %arg3[%c0_12, %c0_13] : memref<1x1xf32, #tpu.memory_space<smem>>
    memref.store %40, %arg3[%c0_12, %c0_13] : memref<1x1xf32, #tpu.memory_space<smem>>
    return
  }
  func.func @transform_0(%arg0: i32) -> (i32, i32) {
    %c0_i32 = arith.constant 0 : i32
    %c0_i32_0 = arith.constant 0 : i32
    return %arg0, %c0_i32 : i32, i32
  }
  func.func @transform_1(%arg0: i32) -> (i32, i32) {
    %c0_i32 = arith.constant 0 : i32
    %c0_i32_0 = arith.constant 0 : i32
    return %arg0, %c0_i32 : i32, i32
  }
  func.func @transform_2(%arg0: i32) -> (i32, i32) {
    %c0_i32 = arith.constant 0 : i32
    %c0_i32_0 = arith.constant 0 : i32
    return %arg0, %c0_i32 : i32, i32
  }
}

</mosaic_0001>

<bundles_post_ra>
// kernel: _focal_loss_call.1
= control target key start
LH: loop header
LB: loop body
LE: loop exit
PB: predicated region body
PF: predicated region fallthrough
CT: control target
= control target key end

     0   :  { %vm20_vm0 = vcmask 130048   ;;  %s128_s0 = inlined_call_operand.vmem [shape: f32[8,16], index: 0, kind: input, shape index: {}]   ;;  %s129_s1 = inlined_call_operand.vmem [shape: s32[8,1], index: 1, kind: input, shape index: {}]   ;;  %s130_s2 = inlined_call_operand.hbm [shape: f32[1,1], index: 2, kind: output, shape index: {}]  }
   0x1   :  { %v12_v0 = vld [vmem:[%s128_s0] sm:$0xff] }
   0x2   :  { %7 = vsyncpa [#allocation3], 0  ;;  %v21_v1 = vsel %vm20_vm0, %v12_v0, -inf  ;;  %v99_v2 = vmov 0   ;;  %v13_v3 = vld [vmem:[%s129_s1] sm:$0xff]  ;;  %v14_v7 = vlaneseq  ;;  %vm52_vm2 = vcmask 7168  }
   0x3   :  { %82 = vset.pattern.permute.xlu0 %v99_v2  ;;  %s100_s1 = smov [#allocation2]  }
   0x4   :  { %22 = vmax.xlane.f32.xlu0 %v21_v1  ;;  %v15_v8 = vand.u32 127, %v14_v7 }
  0x1a   :  { %17 = vperm.xlu0 %82, %v13_v3  }
  0x8d   :  { %v23_v4 = vpop.xlane.xlu0 %22 }
  0x8e   :  { %v28_v5 = vsub.f32 %v12_v0, %v23_v4 }
  0x90   :  { %v29_v6 = vmul.f32 1.442695, %v28_v5 }
  0x92   :  { %83 = vpow2.f32 %v29_v6 }
  0x95   :  { %v18_v9 = vpop.permute.xlu0 %17 }
  0x96   :  { %vm19_vm1 = vcmp.eq.s32.totalorder %v15_v8, %v18_v9 }
  0x97   :  { %v24_v11 = vsel %vm19_vm1, %v12_v0, 0.0 }
  0x98   :  { %v25_v13 = vsel %vm20_vm0, %v24_v11, 0.0 }
  0x9f   :  { %v84_v10 = vpop.eup %83 }
  0xa0   :  { %v31_v12 = vsel %vm20_vm0, %v84_v10, 0.0 }
  0xa1   :  { %32 = vadd.xlane.f32.xlu1 %v31_v12 }
  0xa5   :  { %26 = vadd.xlane.f32.xlu1 %v25_v13 }
 0x12a   :  { %v33_v14 = vpop.xlane.xlu1 %32 }
 0x12b   :  { %85 = vlog2.f32 %v33_v14 }
 0x12e   :  { %v27_v15 = vpop.xlane.xlu1 %26 }
 0x12f   :  { %v36_v18 = vsub.f32 %v27_v15, %v23_v4 }
 0x138   :  { %v86_v16 = vpop.eup %85 }
 0x139   :  { %v35_v17 = vmul.f32 0.6931472, %v86_v16 }
 0x13b   :  { %v37_v19 = vsub.f32 %v35_v17, %v36_v18 }
 0x13d   :  { %v38_v20 = vsub.f32 0.0, %v37_v19 }
 0x13f   :  { %v39_v21 = vmul.f32 1.442695, %v38_v20 }
 0x141   :  { %87 = vpow2.f32 %v39_v21 }
 0x14e   :  { %v88_v22 = vpop.eup %87 }
 0x14f   :  { %v41_v23 = vsub.f32 1.0, %v88_v22 }
 0x151   :  { %v42_v24 = vmax.f32 %v41_v23, 0.0 }
 0x153   :  { %v43_v25 = vmul.f32 %v42_v24, %v42_v24 }
 0x155   :  { %v44_v26 = vmul.f32 %v43_v25, %v37_v19 }
 0x157   :  { %v53_v27 = vsel %vm52_vm2, %v44_v26, 0.0 }
 0x158   :  { %54 = vadd.xlane.f32.xlu1 %v53_v27 }
 0x1e1   :  { %v55_v28 = vpop.xlane.xlu1 %54 }
 0x1e2   :  { %v56_v29 = vrot.slane %v55_v28, 4 }
 0x1e4   :  { %v57_v30 = vadd.f32 %v56_v29, %v55_v28 }
 0x1e6   :  { %v58_v31 = vrot.slane %v57_v30, 2 }
 0x1e8   :  { %v59_v32 = vadd.f32 %v58_v31, %v57_v30 }
 0x1ea   :  { %v60_v33 = vrot.slane %v59_v32, 1 }
 0x1ec   :  { %v61_v34 = vadd.f32 %v60_v33, %v59_v32 }
 0x1ee   :  { %78 = vpush %v61_v34 }
 0x21f   :  { %s79_s0 = spop %78 }
 0x220   :  { %64 = sst [smem:[#allocation2]] %s79_s0 }
 0x221   :  { %72 = dma.smem_to_hbm %s100_s1, 16, %s130_s2, [#allocation3]  }
 0x222   :  { %97 = dma.done.wait [#allocation3], 16  }
 0x223   :  { %98 = vsyncadd [#allocation3], 4294967280 }
 0x224   :  { %76 = sfence }
 0x225   :  { %77 = vsyncpa [#allocation3], 1 }

</bundles_post_ra>
